<compile_context>
chip_gen: v7x
topology: tpu7x:2x2x1
jax: 0.10.0
libtpu: 0.0.40
codegen_flags: <defaults>
</compile_context>

<pallas_src>
import functools

import jax
import jax.numpy as jnp
import numpy as np
from jax import lax
from jax.experimental import pallas as pl
from jax.experimental.pallas import tpu as pltpu

# Scoped-VMEM budget: sized so the largest tiles fit v7x's 64 MiB physical VMEM
# with headroom (v5e/v6e have 128 MiB physical).
_VMEM_LIMIT_BYTES = 48 * 1024 * 1024


def _round_up(x, m):
    return (x + m - 1) // m * m


def _choose_row_tile(m):
    """Largest row tile (multiple of 8) that keeps >= 2 grid steps if possible."""
    for tm in (512, 256, 128):
        if m >= 2 * tm:
            return tm
    return max(8, _round_up(m, 8))


# --------------------------------------------------------------------------
# Pallas kernel: fused multi-matmul + bias (+ residual) (+ ReLU)
#   out = relu?( sum_i x_i @ w_i + bias (+ residual) ),  f32 accumulation.
# Used for conv1+bn1+relu, conv3+bn3(+shortcut conv+bn)+relu, and the
# stride>1 im2col fallback of conv2.
# --------------------------------------------------------------------------
def _fused_mm_kernel(*refs, n_mm, has_residual, apply_relu):
    o_ref = refs[-1]
    acc = None
    idx = 0
    for _ in range(n_mm):
        x_ref, w_ref = refs[idx], refs[idx + 1]
        idx += 2
        d = jnp.dot(x_ref[...], w_ref[...], preferred_element_type=jnp.float32)
        acc = d if acc is None else acc + d
    acc = acc + refs[idx][...]                       # bias (f32)
    idx += 1
    if has_residual:
        acc = acc + refs[idx][...].astype(jnp.float32)
        idx += 1
    if apply_relu:
        acc = jnp.maximum(acc, 0.0)
    o_ref[...] = acc.astype(o_ref.dtype)             # single cast at the store


def fused_matmul(mm_inputs, bias, *, relu, residual=None,
                 out_dtype=jnp.bfloat16):
    """mm_inputs: list of (x (M, K_i) bf16, w (K_i, C) bf16). bias: (1, C) f32."""
    m = mm_inputs[0][0].shape[0]
    c = mm_inputs[0][1].shape[1]
    tm = _choose_row_tile(m)
    m_pad = _round_up(m, tm)

    def pad_rows(a):
        return a if m_pad == m else jnp.pad(a, ((0, m_pad - m), (0, 0)))

    in_specs, args = [], []
    for x, w in mm_inputs:
        k = x.shape[1]
        in_specs.append(pl.BlockSpec((tm, k), lambda i: (i, 0)))
        # NOTE: weight/bias blocks are grid-invariant; pipeline_mode=pl.Buffered(1)
        # would save one weight buffer of VMEM (left at default for robustness).
        in_specs.append(pl.BlockSpec((k, c), lambda i: (0, 0)))
        args += [pad_rows(x), w]
    in_specs.append(pl.BlockSpec((1, c), lambda i: (0, 0)))
    args.append(bias)
    if residual is not None:
        in_specs.append(pl.BlockSpec((tm, c), lambda i: (i, 0)))
        args.append(pad_rows(residual))

    kern = functools.partial(_fused_mm_kernel, n_mm=len(mm_inputs),
                             has_residual=residual is not None,
                             apply_relu=relu)
    out = pl.pallas_call(
        kern,
        out_shape=jax.ShapeDtypeStruct((m_pad, c), out_dtype),
        grid=(m_pad // tm,),
        in_specs=in_specs,
        out_specs=pl.BlockSpec((tm, c), lambda i: (i, 0)),
        compiler_params=pltpu.CompilerParams(
            dimension_semantics=("parallel",),
            vmem_limit_bytes=_VMEM_LIMIT_BYTES),
    )(*args)
    return out if m_pad == m else out[:m]


# --------------------------------------------------------------------------
# Pallas kernel: 3x3 / pad=1 / stride=1 conv + bias + ReLU without im2col.
# The zero-padded image is flattened to rows; every tap (ky,kx) is a constant
# row shift of that slab, so the conv is 9 accumulated (TM,C)@(C,Cout) matmuls
# over a halo row-tile fetched with a manual DMA (memory_space=pl.ANY input).
# Border output rows are computed as garbage and sliced off in the wrapper.
# --------------------------------------------------------------------------
def _conv3x3_kernel(xe_hbm, w_ref, b_ref, o_ref, xbuf, sem, *, tm, wp, halo):
    # xe_hbm : (m_pad + 2*halo, C) f32 in HBM (flattened padded image + halo)
    # w_ref  : (9, C, Cout) bf16 (tap-major, BN scale folded)
    # b_ref  : (1, Cout) f32 ; o_ref : (tm, Cout) ; xbuf : (tm+2*halo, C) f32
    i = pl.program_id(0)
    rows = tm + 2 * halo
    start = pl.multiple_of(i * tm, tm)
    cp = pltpu.make_async_copy(xe_hbm.at[pl.ds(start, rows), :], xbuf, sem)
    cp.start()
    cp.wait()
    # TODO(synk): double-buffer this halo fetch across grid steps (megacore-safe
    #             prefetch) to overlap the DMA with the 9 matmuls.
    cout = b_ref.shape[1]
    acc = jnp.zeros((tm, cout), jnp.float32)
    for ky in range(3):
        for kx in range(3):
            x_tap = xbuf[pl.ds(ky * wp + kx, tm), :].astype(jnp.bfloat16)
            acc = acc + jnp.dot(x_tap, w_ref[ky * 3 + kx],
                                preferred_element_type=jnp.float32)
    acc = acc + b_ref[...]
    o_ref[...] = jnp.maximum(acc, 0.0).astype(o_ref.dtype)


def conv2_3x3_stride1(h1_img, w9, bias):
    """h1_img: (N,H,W,C) bf16 -> (N*H*W, Cout) bf16 ; conv+bn(+bias)+relu."""
    n, h, w, c = h1_img.shape
    hp, wp = h + 2, w + 2
    cout = w9.shape[2]
    m2 = n * hp * wp
    tm = _choose_row_tile(m2)
    m2_pad = _round_up(m2, tm)
    halo = wp + 1

    # Spatial zero-pad, flatten, add halo rows (f32 staging keeps the in-kernel
    # unaligned row slices on the safe 32-bit path).
    xp = jnp.pad(h1_img, ((0, 0), (1, 1), (1, 1), (0, 0))).astype(jnp.float32)
    xe = jnp.pad(xp.reshape(m2, c), ((halo, m2_pad + halo - m2), (0, 0)))

    kern = functools.partial(_conv3x3_kernel, tm=tm, wp=wp, halo=halo)
    out_full = pl.pallas_call(
        kern,
        out_shape=jax.ShapeDtypeStruct((m2_pad, cout), jnp.bfloat16),
        grid=(m2_pad // tm,),
        in_specs=[pl.BlockSpec(memory_space=pl.ANY),      # stays in HBM; manual DMA
                  pl.BlockSpec((9, c, cout), lambda i: (0, 0, 0)),
                  pl.BlockSpec((1, cout), lambda i: (0, 0))],
        out_specs=pl.BlockSpec((tm, cout), lambda i: (i, 0)),
        scratch_shapes=[pltpu.VMEM((tm + 2 * halo, c), jnp.float32),
                        pltpu.SemaphoreType.DMA],
        compiler_params=pltpu.CompilerParams(
            dimension_semantics=("parallel",),
            vmem_limit_bytes=_VMEM_LIMIT_BYTES),
    )(xe, w9, bias)

    out = out_full[:m2].reshape(n, hp, wp, cout)[:, 1:h + 1, 1:w + 1, :]
    return out.reshape(n * h * w, cout)


# --------------------------------------------------------------------------
# Glue: im2col fallback for the stride>1 3x3 conv (kept in bf16).
# --------------------------------------------------------------------------
def _im2col_3x3(x, stride):
    """x: (N,H,W,C) -> (N,Ho,Wo,9*C); column order (ky, kx, cin)."""
    n, h, w, c = x.shape
    ho = (h - 1) // stride + 1
    wo = (w - 1) // stride + 1
    xp = jnp.pad(x, ((0, 0), (1, 1), (1, 1), (0, 0)))
    cols = []
    for ky in range(3):
        for kx in range(3):
            cols.append(xp[:, ky:ky + (ho - 1) * stride + 1:stride,
                           kx:kx + (wo - 1) * stride + 1:stride, :])
    return jnp.concatenate(cols, axis=-1)


# --------------------------------------------------------------------------
# Bottleneck forward
# --------------------------------------------------------------------------
def bottleneck_forward_nhwc(x_nhwc, params, stride, has_shortcut):
    n, h, w, cin = x_nhwc.shape
    ho = (h - 1) // stride + 1
    wo = (w - 1) // stride + 1
    planes = params["w1"].shape[1]
    cout = params["w3"].shape[1]

    x_bf = x_nhwc.astype(jnp.bfloat16)
    x_rows = x_bf.reshape(n * h * w, cin)

    # conv1 (1x1) + bn1 + relu      (BN scale pre-folded into w1)
    h1 = fused_matmul([(x_rows, params["w1"])], params["b1"], relu=True)

    # conv2 (3x3, pad=1, stride) + bn2 + relu
    if stride == 1:
        h2 = conv2_3x3_stride1(h1.reshape(n, h, w, planes),
                               params["w2"], params["b2"])
    else:
        # TODO(synk): stride>1 still uses a bf16 im2col fallback; the in-kernel
        #             9-tap accumulation above only covers stride==1.
        cols = _im2col_3x3(h1.reshape(n, h, w, planes), stride)
        h2 = fused_matmul([(cols.reshape(n * ho * wo, 9 * planes),
                            params["w2"].reshape(9 * planes, planes))],
                          params["b2"], relu=True)

    # conv3 (1x1) + bn3 + shortcut + relu  (projection shortcut fused as a
    # second matmul into the same accumulator; identity shortcut as residual)
    if has_shortcut:
        xs = x_bf[:, ::stride, ::stride, :].reshape(n * ho * wo, cin)
        out = fused_matmul([(h2, params["w3"]), (xs, params["wsc"])],
                           params["b3sc"], relu=True, out_dtype=jnp.float32)
    else:
        res = x_nhwc.reshape(n * ho * wo, cout)   # f32 identity residual
        out = fused_matmul([(h2, params["w3"])], params["b3"], relu=True,
                           residual=res, out_dtype=jnp.float32)
    return out.reshape(n, ho, wo, cout)


def bottleneck_forward(x_nchw, params, stride, has_shortcut):
    # NCHW adapter for parity with the PyTorch module.
    x = jnp.transpose(x_nchw, (0, 2, 3, 1)).astype(jnp.float32)
    out = bottleneck_forward_nhwc(x, params, stride, has_shortcut)
    return jnp.transpose(out, (0, 3, 1, 2))


# --------------------------------------------------------------------------
# Deterministic synthetic parameters (eval-mode BN folded, weights in bf16)
# --------------------------------------------------------------------------
def init_params(key, in_planes, planes, stride):
    expansion = 4
    cout = expansion * planes
    keys = jax.random.split(key, 8)

    def conv_w(k, shape, fan_in):
        return jax.random.normal(k, shape, jnp.float32) / np.sqrt(fan_in)

    def bn_fold(k, c):
        kg, kb, km, kv = jax.random.split(k, 4)
        gamma = 1.0 + 0.1 * jax.random.normal(kg, (c,), jnp.float32)
        beta = 0.1 * jax.random.normal(kb, (c,), jnp.float32)
        mean = 0.1 * jax.random.normal(km, (c,), jnp.float32)
        var = jnp.abs(jax.random.normal(kv, (c,), jnp.float32)) + 0.5
        scale = gamma / jnp.sqrt(var + 1e-5)
        bias = beta - mean * scale
        return scale, bias

    w1 = conv_w(keys[0], (in_planes, planes), in_planes)          # 1x1
    w2 = conv_w(keys[1], (3, 3, planes, planes), 9 * planes)      # HWIO
    w3 = conv_w(keys[2], (planes, cout), planes)                  # 1x1
    s1, b1 = bn_fold(keys[3], planes)
    s2, b2 = bn_fold(keys[4], planes)
    s3, b3 = bn_fold(keys[5], cout)

    params = dict(
        w1=(w1 * s1).astype(jnp.bfloat16),
        w2=(w2 * s2).astype(jnp.bfloat16).reshape(9, planes, planes),
        w3=(w3 * s3).astype(jnp.bfloat16),
        b1=b1.reshape(1, planes),
        b2=b2.reshape(1, planes),
        b3=b3.reshape(1, cout),
    )

    has_shortcut = (stride != 1) or (in_planes != cout)
    if has_shortcut:
        wsc = conv_w(keys[6], (in_planes, cout), in_planes)
        ssc, bsc = bn_fold(keys[7], cout)
        params["wsc"] = (wsc * ssc).astype(jnp.bfloat16)
        params["bsc"] = bsc.reshape(1, cout)
        params["b3sc"] = params["b3"] + params["bsc"]
    return params, has_shortcut


# --------------------------------------------------------------------------
# Pure-JAX reference (same bf16 weight/activation rounding, f32 accumulation)
# --------------------------------------------------------------------------
def reference(x_nchw, params, stride, has_shortcut):
    f32 = jnp.float32
    dn = ("NHWC", "HWIO", "NHWC")

    def conv(a, w_hwio, s, pad):
        return lax.conv_general_dilated(a, w_hwio, (s, s), pad,
                                        dimension_numbers=dn)

    def q(a):                          # round-trip through bf16 (kernel storage)
        return a.astype(jnp.bfloat16).astype(f32)

    x = jnp.transpose(x_nchw, (0, 2, 3, 1)).astype(f32)
    xb = q(x)
    planes = params["w1"].shape[1]
    w1 = params["w1"].astype(f32)[None, None]
    w2 = params["w2"].astype(f32).reshape(3, 3, planes, planes)
    w3 = params["w3"].astype(f32)[None, None]

    h = jnp.maximum(conv(xb, w1, 1, "VALID") + params["b1"], 0.0)
    h = jnp.maximum(conv(q(h), w2, stride, ((1, 1), (1, 1))) + params["b2"], 0.0)
    h = conv(q(h), w3, 1, "VALID") + params["b3"]
    if has_shortcut:
        wsc = params["wsc"].astype(f32)[None, None]
        h = h + conv(xb, wsc, stride, "VALID") + params["bsc"]
    else:
        h = h + x
    out = jnp.maximum(h, 0.0)
    return jnp.transpose(out, (0, 3, 1, 2))


if __name__ == "__main__":
    key = jax.random.PRNGKey(0)
    kx, kparam = jax.random.split(key)

    # Small shapes consistent with the module's forward: NCHW input.
    N, Cin, H, W = 2, 4, 16, 16
    planes, stride = 4, 1              # -> out channels = expansion*planes = 16

    x = jax.random.normal(kx, (N, Cin, H, W), jnp.float32)
    params, has_shortcut = init_params(kparam, Cin, planes, stride)

    out = bottleneck_forward(x, params, stride, has_shortcut)
    out = jax.block_until_ready(out)

    ref = reference(x, params, stride, has_shortcut)
    np.testing.assert_allclose(np.asarray(out), np.asarray(ref),
                               rtol=1e-2, atol=1e-2)
    assert out.shape == (N, 4 * planes, H // stride, W // stride)
    print("KERNEL_OK")
</pallas_src>

<mosaic_0001>
module attributes {stable_mosaic.version = 11 : i64} {
  func.func @_fused_mm_kernel(%arg0: i32, %arg1: memref<256x4xbf16, #tpu.memory_space<vmem>>, %arg2: memref<4x4xbf16, #tpu.memory_space<vmem>>, %arg3: memref<1x4xf32, #tpu.memory_space<vmem>>, %arg4: memref<256x4xbf16, #tpu.memory_space<vmem>>) attributes {dimension_semantics = [#tpu.dimension_semantics<parallel>], iteration_bounds = array<i64: 2>, scalar_prefetch = 0 : i64, scratch_operands = 0 : i64, tpu.core_type = #tpu.core_type<tc>, window_params = [{transform_indices = @transform_0, window_bounds = array<i64: 256, 4>}, {pipeline_mode = #tpu.pipeline_mode<synchronous>, transform_indices = @transform_1, window_bounds = array<i64: 4, 4>}, {pipeline_mode = #tpu.pipeline_mode<synchronous>, transform_indices = @transform_2, window_bounds = array<i64: 1, 4>}, {transform_indices = @transform_3, window_bounds = array<i64: 256, 4>}]} {
    %c0 = arith.constant 0 : index
    %c0_0 = arith.constant 0 : index
    %0 = vector.load %arg1[%c0, %c0_0] : memref<256x4xbf16, #tpu.memory_space<vmem>>, vector<256x4xbf16>
    %c0_1 = arith.constant 0 : index
    %c0_2 = arith.constant 0 : index
    %1 = vector.load %arg2[%c0_1, %c0_2] : memref<4x4xbf16, #tpu.memory_space<vmem>>, vector<4x4xbf16>
    %cst = arith.constant dense<0.000000e+00> : vector<256x4xf32>
    %2 = tpu.matmul %0, %1, %cst {dimension_numbers = #tpu.dot_dimension_numbers<[1], [0], [0], [1], [0, 0, 1, 1], [], []>} : vector<256x4xbf16>, vector<4x4xbf16>, vector<256x4xf32> -> vector<256x4xf32>
    %c0_3 = arith.constant 0 : index
    %c0_4 = arith.constant 0 : index
    %3 = vector.load %arg3[%c0_3, %c0_4] : memref<1x4xf32, #tpu.memory_space<vmem>>, vector<1x4xf32>
    %4 = vector.broadcast %3 : vector<1x4xf32> to vector<256x4xf32>
    %5 = arith.addf %2, %4 : vector<256x4xf32>
    %cst_5 = arith.constant 0.000000e+00 : f32
    %6 = vector.broadcast %cst_5 : f32 to vector<256x4xf32>
    %7 = arith.maximumf %5, %6 : vector<256x4xf32>
    %8 = arith.truncf %7 : vector<256x4xf32> to vector<256x4xbf16>
    %c0_6 = arith.constant 0 : index
    %c0_7 = arith.constant 0 : index
    %9 = vector.load %arg4[%c0_6, %c0_7] : memref<256x4xbf16, #tpu.memory_space<vmem>>, vector<256x4xbf16>
    tpu.vector_store %arg4[%c0_6, %c0_7], %8 {strides = array<i32>} : memref<256x4xbf16, #tpu.memory_space<vmem>>, vector<256x4xbf16>,
    return
  }
  func.func @transform_0(%arg0: i32) -> (i32, i32) {
    %c0_i32 = arith.constant 0 : i32
    %c0_i32_0 = arith.constant 0 : i32
    return %arg0, %c0_i32 : i32, i32
  }
  func.func @transform_1(%arg0: i32) -> (i32, i32) {
    %c0_i32 = arith.constant 0 : i32
    %c0_i32_0 = arith.constant 0 : i32
    %c0_i32_1 = arith.constant 0 : i32
    return %c0_i32, %c0_i32_0 : i32, i32
  }
  func.func @transform_2(%arg0: i32) -> (i32, i32) {
    %c0_i32 = arith.constant 0 : i32
    %c0_i32_0 = arith.constant 0 : i32
    %c0_i32_1 = arith.constant 0 : i32
    return %c0_i32, %c0_i32_0 : i32, i32
  }
  func.func @transform_3(%arg0: i32) -> (i32, i32) {
    %c0_i32 = arith.constant 0 : i32
    %c0_i32_0 = arith.constant 0 : i32
    return %arg0, %c0_i32 : i32, i32
  }
}

</mosaic_0001>

<bundles_post_ra>
// kernel: tpu_custom_call.1
= control target key start
LH: loop header
LB: loop body
LE: loop exit
PB: predicated region body
PF: predicated region fallthrough
CT: control target
= control target key end

     0   :  { %s973_s12 = smov 0   ;;  %s1137_s0 = inlined_call_operand.vmem [shape: bf16[512,4], index: 0, kind: input, shape index: {}]   ;;  %s1138_s1 = inlined_call_operand.vmem [shape: bf16[4,4], index: 1, kind: input, shape index: {}]   ;;  %s1139_s2 = inlined_call_operand.vmem [shape: f32[1,4], index: 2, kind: input, shape index: {}]   ;;  %s1140_s3 = inlined_call_operand.vmem [shape: bf16[512,4], index: 3, kind: output, shape index: {}]  }
   0x1 LB: > { %s758_s13 = sadd.s32 4294967295, %s951_s12   ;;  %p762_p0 = scmp.ge.s32.totalorder %s951_s12, 1  ;;  %s951_s12 = sphi %s973_s12, %s13_s12  }
   0x2   : > { %p138_p1 = scmp.lt.s32.totalorder %s951_s12, 3 }
   0x4   : > { %p139_p2 = pnand %p762_p0, %p138_p1 }
   0x5   : > { %v207_v0 = vld [vmem:[%s1138_s1] sm:$0x3] (!%p139_p2)  ;;  %vm344_vm0 = vcmask (!%p139_p2), 1041408   ;;  %s763_s16 = sshll.u32 (!%p139_p2), %s758_s13, 5  ;;  %vm295_vm1 = vcmask (!%p139_p2), 31744   ;;  %vm669_vm2 = vcmask (!%p139_p2), 27648  }
   0x6   : > { %142 = sbr.rel (%p139_p2) target bundleno = 265 (0x109), region = 32  ;;  %919 = vmatprep.subr.msk.bf16.mxu0 (!%p139_p2), %vm344_vm0, %v207_v0  ;;  %920 = vmatprep.subr.msk.bf16.mxu1 (!%p139_p2), %vm344_vm0, %v207_v0  ;;  %v346_v1 = vsel (!%p139_p2), %vm344_vm0, %v207_v0, 0  ;;  %p163_p3 = scmp.lt.s32.totalorder (!%p139_p2), %s763_s16, 63  ;;  %v1029_v18 = vld [vmem:[%s1139_s2] ss:$0 sm:$0xff] (!%p139_p2) }
   0x7   : > { %884 = vmatpush3.bf16.msra.mxu0 (!%p139_p2), %v346_v1  ;;  %918 = vmatpush3.bf16.msra.mxu1 (!%p139_p2), %v346_v1 }
   0xd   : > { %s1142_s16 = smov (!%p163_p3, %s763_s16), 63 }
   0xe   : > { %s764_s17 = sshll.u32 %s1142_s16, 2 }
   0xf   : > { %s992_s20 = scalar_lea.vmem %s1137_s0, %s764_s17  ;;  %s1041_s25 = scalar_lea.vmem %s1140_s3, %s764_s17 }
  0x10   : > { %v929_v2 = vld [vmem:[%s992_s20] sm:$0xff]   ;;  %v931_v4 = vld [vmem:[%s992_s20 + $0x8] sm:$0xff]   ;;  %v933_v6 = vld [vmem:[%s992_s20 + $0x10] sm:$0xff]  }
  0x11   : > { %v930_v3 = vld [vmem:[%s992_s20 + $0x40] sm:$0xff]   ;;  %885 = vmatprep.mubr.msk.bf16.mxu0 %vm295_vm1, %v929_v2  ;;  %v932_v5 = vld [vmem:[%s992_s20 + $0x48] sm:$0xff]   ;;  %v934_v7 = vld [vmem:[%s992_s20 + $0x50] sm:$0xff]  }
  0x12   : > { %901 = vmatprep.mubr.msk.bf16.mxu1 %vm295_vm1, %v930_v3  ;;  %886 = vmatmul.mubr.msk.bf16.vlgmr.msra.gmra.mrb[0].mxu0 %vm295_vm1, %v931_v4  ;;  %v935_v8 = vld [vmem:[%s992_s20 + $0x18] sm:$0xff]   ;;  %v937_v10 = vld [vmem:[%s992_s20 + $0x20] sm:$0xff]   ;;  %v939_v12 = vld [vmem:[%s992_s20 + $0x28] sm:$0xff]  }
  0x13   : > { %902 = vmatmul.mubr.msk.bf16.vlgmr.msra.gmra.mrb[0].mxu1 %vm295_vm1, %v932_v5  ;;  %889 = vmatprep.mubr.msk.bf16.mxu0 %vm295_vm1, %v933_v6  ;;  %v936_v9 = vld [vmem:[%s992_s20 + $0x58] sm:$0xff]   ;;  %v938_v11 = vld [vmem:[%s992_s20 + $0x60] sm:$0xff]   ;;  %v940_v13 = vld [vmem:[%s992_s20 + $0x68] sm:$0xff]  }
  0x14   : > { %905 = vmatprep.mubr.msk.bf16.mxu1 %vm295_vm1, %v934_v7  ;;  %v941_v14 = vld [vmem:[%s992_s20 + $0x30] sm:$0xff]   ;;  %v943_v16 = vld [vmem:[%s992_s20 + $0x38] sm:$0xff]  }
  0x15   : > { %v942_v15 = vld [vmem:[%s992_s20 + $0x70] sm:$0xff]   ;;  %v944_v17 = vld [vmem:[%s992_s20 + $0x78] sm:$0xff]  }
  0x1a   : > { %890 = vmatmul.mubr.msk.bf16.gmra.mrb[4].mxu0 %vm295_vm1, %v935_v8 }
  0x1b   : > { %906 = vmatmul.mubr.msk.bf16.gmra.mrb[4].mxu1 %vm295_vm1, %v936_v9  ;;  %893 = vmatprep.mubr.msk.bf16.mxu0 %vm295_vm1, %v937_v10 }
  0x1c   : > { %909 = vmatprep.mubr.msk.bf16.mxu1 %vm295_vm1, %v938_v11 }
  0x22   : > { %894 = vmatmul.mubr.msk.bf16.gmra.mrb[8].mxu0 %vm295_vm1, %v939_v12 }
  0x23   : > { %910 = vmatmul.mubr.msk.bf16.gmra.mrb[8].mxu1 %vm295_vm1, %v940_v13  ;;  %897 = vmatprep.mubr.msk.bf16.mxu0 %vm295_vm1, %v941_v14 }
  0x24   : > { %913 = vmatprep.mubr.msk.bf16.mxu1 %vm295_vm1, %v942_v15 }
  0x2a   : > { %898 = vmatmul.mubr.msk.bf16.gmra.mrb[12].mxu0 %vm295_vm1, %v943_v16 }
  0x2b   : > { %914 = vmatmul.mubr.msk.bf16.gmra.mrb[12].mxu1 %vm295_vm1, %v944_v17 }
  0xe5   : > { %v887_v19 = vpop.f32.mrb[0].mxu0 }
  0xe6   : > { %v391_v20 = vadd.f32 %v887_v19, %v1029_v18  ;;  %v903_v21 = vpop.f32.mrb[0].mxu1  ;;  %v382_v22 = vpop.f32.mrb[1].mxu0 }
  0xe7   : > { %v455_v23 = vadd.f32 %v903_v21, %v1029_v18  ;;  %v383_v24 = vadd.f32 %v1029_v18, %v382_v22  ;;  %v446_v25 = vpop.f32.mrb[1].mxu1  ;;  %v888_v26 = vpop.f32.mrb[2].mxu0 }
  0xe8   : > { %v511_v27 = vmax.f32 %v391_v20, 0.0  ;;  %v447_v28 = vadd.f32 %v1029_v18, %v446_v25  ;;  %v394_v29 = vadd.f32 %v888_v26, %v1029_v18  ;;  %v904_v30 = vpop.f32.mrb[2].mxu1  ;;  %v385_v31 = vpop.f32.mrb[3].mxu0 }
  0xe9   : > { %v527_v32 = vmax.f32 %v455_v23, 0.0  ;;  %v509_v33 = vmax.f32 %v383_v24, 0.0  ;;  %v458_v34 = vadd.f32 %v904_v30, %v1029_v18  ;;  %v386_v35 = vadd.f32 %v1029_v18, %v385_v31  ;;  %v449_v36 = vpop.f32.mrb[3].mxu1 }
  0xea   : > { %v836_v37 = vpack.c.bf16 %v511_v27, %v511_v27  ;;  %v525_v38 = vmax.f32 %v447_v28, 0.0  ;;  %v512_v39 = vmax.f32 %v394_v29, 0.0  ;;  %v450_v40 = vadd.f32 %v1029_v18, %v449_v36 }
  0xeb   : > { %v852_v41 = vpack.c.bf16 %v527_v32, %v527_v32  ;;  %v834_v42 = vpack.c.bf16 %v509_v33, %v509_v33  ;;  %v528_v43 = vmax.f32 %v458_v34, 0.0  ;;  %v510_v44 = vmax.f32 %v386_v35, 0.0 }
  0xec   : > { %672 = vst.msk [vmem:[%s1041_s25 + $0x8] sm:$0xf] %vm669_vm2, %v836_v37  ;;  %v850_v45 = vpack.c.bf16 %v525_v38, %v525_v38  ;;  %v837_v46 = vpack.c.bf16 %v512_v39, %v512_v39  ;;  %v526_v47 = vmax.f32 %v450_v40, 0.0 }
  0xed   : > { %688 = vst.msk [vmem:[%s1041_s25 + $0x48] sm:$0xf] %vm669_vm2, %v852_v41  ;;  %670 = vst.msk [vmem:[%s1041_s25] sm:$0xf] %vm669_vm2, %v834_v42  ;;  %v853_v48 = vpack.c.bf16 %v528_v43, %v528_v43  ;;  %v835_v49 = vpack.c.bf16 %v510_v44, %v510_v44  ;;  %v891_v50 = vpop.f32.mrb[4].mxu0 }
  0xee   : > { %686 = vst.msk [vmem:[%s1041_s25 + $0x40] sm:$0xf] %vm669_vm2, %v850_v45  ;;  %673 = vst.msk [vmem:[%s1041_s25 + $0xc] sm:$0xf] %vm669_vm2, %v837_v46  ;;  %v851_v51 = vpack.c.bf16 %v526_v47, %v526_v47  ;;  %v407_v52 = vadd.f32 %v891_v50, %v1029_v18  ;;  %v907_v53 = vpop.f32.mrb[4].mxu1  ;;  %v398_v54 = vpop.f32.mrb[5].mxu0 }
  0xef   : > { %689 = vst.msk [vmem:[%s1041_s25 + $0x4c] sm:$0xf] %vm669_vm2, %v853_v48  ;;  %671 = vst.msk [vmem:[%s1041_s25 + $0x4] sm:$0xf] %vm669_vm2, %v835_v49  ;;  %v471_v55 = vadd.f32 %v907_v53, %v1029_v18  ;;  %v399_v56 = vadd.f32 %v1029_v18, %v398_v54  ;;  %v462_v57 = vpop.f32.mrb[5].mxu1  ;;  %v892_v58 = vpop.f32.mrb[6].mxu0 }
  0xf0   : > { %687 = vst.msk [vmem:[%s1041_s25 + $0x44] sm:$0xf] %vm669_vm2, %v851_v51  ;;  %v515_v59 = vmax.f32 %v407_v52, 0.0  ;;  %v463_v60 = vadd.f32 %v1029_v18, %v462_v57  ;;  %v410_v61 = vadd.f32 %v892_v58, %v1029_v18  ;;  %v908_v62 = vpop.f32.mrb[6].mxu1  ;;  %v401_v63 = vpop.f32.mrb[7].mxu0 }
  0xf1   : > { %v531_v0 = vmax.f32 %v471_v55, 0.0  ;;  %v513_v1 = vmax.f32 %v399_v56, 0.0  ;;  %v474_v2 = vadd.f32 %v908_v62, %v1029_v18  ;;  %v402_v3 = vadd.f32 %v1029_v18, %v401_v63  ;;  %v465_v4 = vpop.f32.mrb[7].mxu1 }
  0xf2   : > { %v840_v5 = vpack.c.bf16 %v515_v59, %v515_v59  ;;  %v529_v6 = vmax.f32 %v463_v60, 0.0  ;;  %v516_v7 = vmax.f32 %v410_v61, 0.0  ;;  %v466_v8 = vadd.f32 %v1029_v18, %v465_v4 }
  0xf3   : > { %v856_v9 = vpack.c.bf16 %v531_v0, %v531_v0  ;;  %v838_v10 = vpack.c.bf16 %v513_v1, %v513_v1  ;;  %v532_v11 = vmax.f32 %v474_v2, 0.0  ;;  %v514_v12 = vmax.f32 %v402_v3, 0.0 }
  0xf4   : > { %676 = vst.msk [vmem:[%s1041_s25 + $0x18] sm:$0xf] %vm669_vm2, %v840_v5  ;;  %v854_v13 = vpack.c.bf16 %v529_v6, %v529_v6  ;;  %v841_v14 = vpack.c.bf16 %v516_v7, %v516_v7  ;;  %v530_v15 = vmax.f32 %v466_v8, 0.0 }
  0xf5   : > { %692 = vst.msk [vmem:[%s1041_s25 + $0x58] sm:$0xf] %vm669_vm2, %v856_v9  ;;  %674 = vst.msk [vmem:[%s1041_s25 + $0x10] sm:$0xf] %vm669_vm2, %v838_v10  ;;  %v857_v16 = vpack.c.bf16 %v532_v11, %v532_v11  ;;  %v839_v17 = vpack.c.bf16 %v514_v12, %v514_v12  ;;  %v895_v19 = vpop.f32.mrb[8].mxu0 }
  0xf6   : > { %690 = vst.msk [vmem:[%s1041_s25 + $0x50] sm:$0xf] %vm669_vm2, %v854_v13  ;;  %677 = vst.msk [vmem:[%s1041_s25 + $0x1c] sm:$0xf] %vm669_vm2, %v841_v14  ;;  %v855_v20 = vpack.c.bf16 %v530_v15, %v530_v15  ;;  %v423_v21 = vadd.f32 %v895_v19, %v1029_v18  ;;  %v911_v22 = vpop.f32.mrb[8].mxu1  ;;  %v414_v23 = vpop.f32.mrb[9].mxu0 }
  0xf7   : > { %693 = vst.msk [vmem:[%s1041_s25 + $0x5c] sm:$0xf] %vm669_vm2, %v857_v16  ;;  %675 = vst.msk [vmem:[%s1041_s25 + $0x14] sm:$0xf] %vm669_vm2, %v839_v17  ;;  %v487_v24 = vadd.f32 %v911_v22, %v1029_v18  ;;  %v415_v25 = vadd.f32 %v1029_v18, %v414_v23  ;;  %v478_v26 = vpop.f32.mrb[9].mxu1  ;;  %v896_v27 = vpop.f32.mrb[10].mxu0 }
  0xf8   : > { %691 = vst.msk [vmem:[%s1041_s25 + $0x54] sm:$0xf] %vm669_vm2, %v855_v20  ;;  %v519_v28 = vmax.f32 %v423_v21, 0.0  ;;  %v479_v29 = vadd.f32 %v1029_v18, %v478_v26  ;;  %v426_v30 = vadd.f32 %v896_v27, %v1029_v18  ;;  %v912_v31 = vpop.f32.mrb[10].mxu1  ;;  %v417_v32 = vpop.f32.mrb[11].mxu0 }
  0xf9   : > { %v535_v33 = vmax.f32 %v487_v24, 0.0  ;;  %v517_v34 = vmax.f32 %v415_v25, 0.0  ;;  %v490_v35 = vadd.f32 %v912_v31, %v1029_v18  ;;  %v418_v36 = vadd.f32 %v1029_v18, %v417_v32  ;;  %v481_v37 = vpop.f32.mrb[11].mxu1 }
  0xfa   : > { %v844_v38 = vpack.c.bf16 %v519_v28, %v519_v28  ;;  %v533_v39 = vmax.f32 %v479_v29, 0.0  ;;  %v520_v40 = vmax.f32 %v426_v30, 0.0  ;;  %v482_v41 = vadd.f32 %v1029_v18, %v481_v37 }
  0xfb   : > { %v860_v42 = vpack.c.bf16 %v535_v33, %v535_v33  ;;  %v842_v43 = vpack.c.bf16 %v517_v34, %v517_v34  ;;  %v536_v44 = vmax.f32 %v490_v35, 0.0  ;;  %v518_v45 = vmax.f32 %v418_v36, 0.0 }
  0xfc   : > { %680 = vst.msk [vmem:[%s1041_s25 + $0x28] sm:$0xf] %vm669_vm2, %v844_v38  ;;  %v858_v46 = vpack.c.bf16 %v533_v39, %v533_v39  ;;  %v845_v47 = vpack.c.bf16 %v520_v40, %v520_v40  ;;  %v534_v48 = vmax.f32 %v482_v41, 0.0 }
  0xfd   : > { %696 = vst.msk [vmem:[%s1041_s25 + $0x68] sm:$0xf] %vm669_vm2, %v860_v42  ;;  %678 = vst.msk [vmem:[%s1041_s25 + $0x20] sm:$0xf] %vm669_vm2, %v842_v43  ;;  %v861_v49 = vpack.c.bf16 %v536_v44, %v536_v44  ;;  %v843_v50 = vpack.c.bf16 %v518_v45, %v518_v45  ;;  %v899_v51 = vpop.f32.mrb[12].mxu0 }
  0xfe   : > { %694 = vst.msk [vmem:[%s1041_s25 + $0x60] sm:$0xf] %vm669_vm2, %v858_v46  ;;  %681 = vst.msk [vmem:[%s1041_s25 + $0x2c] sm:$0xf] %vm669_vm2, %v845_v47  ;;  %v859_v52 = vpack.c.bf16 %v534_v48, %v534_v48  ;;  %v439_v53 = vadd.f32 %v899_v51, %v1029_v18  ;;  %v915_v54 = vpop.f32.mrb[12].mxu1  ;;  %v430_v55 = vpop.f32.mrb[13].mxu0 }
  0xff   : > { %697 = vst.msk [vmem:[%s1041_s25 + $0x6c] sm:$0xf] %vm669_vm2, %v861_v49  ;;  %679 = vst.msk [vmem:[%s1041_s25 + $0x24] sm:$0xf] %vm669_vm2, %v843_v50  ;;  %v503_v56 = vadd.f32 %v915_v54, %v1029_v18  ;;  %v431_v57 = vadd.f32 %v1029_v18, %v430_v55  ;;  %v494_v58 = vpop.f32.mrb[13].mxu1  ;;  %v900_v59 = vpop.f32.mrb[14].mxu0 }
 0x100   : > { %695 = vst.msk [vmem:[%s1041_s25 + $0x64] sm:$0xf] %vm669_vm2, %v859_v52  ;;  %v523_v60 = vmax.f32 %v439_v53, 0.0  ;;  %v495_v61 = vadd.f32 %v1029_v18, %v494_v58  ;;  %v442_v62 = vadd.f32 %v900_v59, %v1029_v18  ;;  %v916_v63 = vpop.f32.mrb[14].mxu1  ;;  %v433_v0 = vpop.f32.mrb[15].mxu0 }
 0x101   : > { %v539_v1 = vmax.f32 %v503_v56, 0.0  ;;  %v521_v2 = vmax.f32 %v431_v57, 0.0  ;;  %v506_v3 = vadd.f32 %v916_v63, %v1029_v18  ;;  %v434_v4 = vadd.f32 %v1029_v18, %v433_v0  ;;  %v497_v5 = vpop.f32.mrb[15].mxu1 }
 0x102   : > { %v848_v6 = vpack.c.bf16 %v523_v60, %v523_v60  ;;  %v537_v7 = vmax.f32 %v495_v61, 0.0  ;;  %v524_v8 = vmax.f32 %v442_v62, 0.0  ;;  %v498_v9 = vadd.f32 %v1029_v18, %v497_v5 }
 0x103   : > { %v864_v10 = vpack.c.bf16 %v539_v1, %v539_v1  ;;  %v846_v11 = vpack.c.bf16 %v521_v2, %v521_v2  ;;  %v540_v12 = vmax.f32 %v506_v3, 0.0  ;;  %v522_v13 = vmax.f32 %v434_v4, 0.0 }
 0x104   : > { %684 = vst.msk [vmem:[%s1041_s25 + $0x38] sm:$0xf] %vm669_vm2, %v848_v6  ;;  %v862_v14 = vpack.c.bf16 %v537_v7, %v537_v7  ;;  %v849_v15 = vpack.c.bf16 %v524_v8, %v524_v8  ;;  %v538_v16 = vmax.f32 %v498_v9, 0.0 }
 0x105   : > { %700 = vst.msk [vmem:[%s1041_s25 + $0x78] sm:$0xf] %vm669_vm2, %v864_v10  ;;  %682 = vst.msk [vmem:[%s1041_s25 + $0x30] sm:$0xf] %vm669_vm2, %v846_v11  ;;  %v865_v17 = vpack.c.bf16 %v540_v12, %v540_v12  ;;  %v847_v19 = vpack.c.bf16 %v522_v13, %v522_v13 }
 0x106   : > { %698 = vst.msk [vmem:[%s1041_s25 + $0x70] sm:$0xf] %vm669_vm2, %v862_v14  ;;  %685 = vst.msk [vmem:[%s1041_s25 + $0x3c] sm:$0xf] %vm669_vm2, %v849_v15  ;;  %v863_v18 = vpack.c.bf16 %v538_v16, %v538_v16 }
 0x107   : > { %701 = vst.msk [vmem:[%s1041_s25 + $0x7c] sm:$0xf] %vm669_vm2, %v865_v17  ;;  %683 = vst.msk [vmem:[%s1041_s25 + $0x34] sm:$0xf] %vm669_vm2, %v847_v19 }
 0x108   : > { %699 = vst.msk [vmem:[%s1041_s25 + $0x74] sm:$0xf] %vm669_vm2, %v863_v18 }
 0x109 PF: > { %s13_s12 = sadd.s32 1, %s951_s12  }
 0x10a   : > { %p10_p4 = scmp.ge.s32.totalorder %s13_s12, 4  }
 0x10c   :  { %12 = sbr.rel (!%p10_p4) target bundleno = 1 (0x1), region = 62 }

</bundles_post_ra>
